<compile_context>
chip_gen: v7x
topology: tpu7x:2x2x1
jax: 0.10.0
libtpu: 0.0.40
codegen_flags: <defaults>
</compile_context>

<pallas_src>
import jax
import jax.numpy as jnp
from jax.experimental import pallas as pl
from jax.experimental.pallas import tpu as pltpu


def _make_kernel(true_b, tile_b):
    needs_mask = (true_b % tile_b) != 0

    def kernel(x_ref, o_ref, acc_ref):
        i = pl.program_id(0)

        @pl.when(i == 0)
        def _init():
            acc_ref[...] = jnp.zeros_like(acc_ref)

        # In-register upcast: HBM traffic stays at the input's native width.
        x = x_ref[...].astype(jnp.float32)                      # (tile_b, N)

        # loss_i = logsumexp(x_i) - x_i[0]   (CrossEntropy with target 0)
        m = jnp.max(x, axis=-1, keepdims=True)                  # (tile_b, 1)
        lse = m + jnp.log(jnp.sum(jnp.exp(x - m), axis=-1, keepdims=True))
        per_row = lse - x[:, 0:1]                               # (tile_b, 1)

        if needs_mask:
            # Mask rows of the padded last tile (padding content is garbage).
            row_ids = i * tile_b + jax.lax.broadcasted_iota(
                jnp.int32, (tile_b, 1), 0)
            per_row = jnp.where(row_ids < true_b, per_row, 0.0)

        # Collapse the tile to a scalar partial sum immediately.
        acc_ref[...] += jnp.sum(per_row)

        @pl.when(i == pl.num_programs(0) - 1)
        def _finalize():
            o_ref[...] = acc_ref[...] * (1.0 / true_b)

    return kernel


def _choose_tile_b(B, N, itemsize):
    # ~4 MiB per input buffer => 8 MiB double-buffered: comfortably inside the
    # default scoped VMEM on v5e (16 MiB), v6e (32 MiB) and v7x (32 MiB).
    sub = 8 * max(1, 4 // itemsize)          # native sublane multiple for dtype
    tile = (4 * 1024 * 1024) // max(1, N * itemsize)
    tile = max(sub, min(tile, 1024))
    tile = (tile // sub) * sub
    if B <= tile:
        return B
    return tile


def nce_softmax_loss(x, tile_b=None):
    """x: (bsz, n_classes, 1) or (bsz, n_classes). Returns scalar f32 loss."""
    # torch `x.squeeze()` for the typical (bsz, n_classes, 1) input.
    if x.ndim == 3 and x.shape[-1] == 1:
        x2d = x[..., 0]
    elif x.ndim == 2:
        x2d = x
    else:
        x2d = jnp.squeeze(x)
    assert x2d.ndim == 2, "expected (bsz, n_classes) logits after squeeze"

    B, N = x2d.shape
    itemsize = jnp.dtype(x2d.dtype).itemsize
    sub = 8 * max(1, 4 // itemsize)

    if tile_b is None:
        tile_b = _choose_tile_b(B, N, itemsize)
    tile_b = min(int(tile_b), B)
    if tile_b < B:
        tile_b = max(sub, (tile_b // sub) * sub)   # keep blocks sublane-aligned
    num_tiles = pl.cdiv(B, tile_b)

    # TODO(synk): for very large n_classes (rows of f32 blowing the VMEM
    # budget), add a second innermost grid axis over N with online logsumexp.

    kernel = _make_kernel(B, tile_b)

    cost = pl.CostEstimate(
        flops=3 * B * N,
        transcendentals=B * N,
        bytes_accessed=B * N * itemsize + 4,
    )

    out = pl.pallas_call(
        kernel,
        out_shape=jax.ShapeDtypeStruct((1, 1), jnp.float32),
        grid=(num_tiles,),
        in_specs=[pl.BlockSpec((tile_b, N), lambda i: (i, 0))],
        out_specs=pl.BlockSpec((1, 1), lambda i: (0, 0)),
        scratch_shapes=[pltpu.VMEM((1, 1), jnp.float32)],
        compiler_params=pltpu.CompilerParams(
            dimension_semantics=("arbitrary",)),  # accumulator-carrying axis
        cost_estimate=cost,
    )(x2d)
    return out[0, 0]


if __name__ == "__main__":
    key = jax.random.PRNGKey(0)
    # Typical NCE shape: (bsz, K+1 candidates, 1). Small deterministic example.
    bsz, n_classes = 8, 128
    x = jax.random.normal(key, (bsz, n_classes, 1), dtype=jnp.float32)

    loss = jax.block_until_ready(nce_softmax_loss(x))
    x2d = x[..., 0]
    ref = jnp.mean(jax.nn.logsumexp(x2d, axis=-1) - x2d[:, 0])
    assert jnp.allclose(loss, ref, rtol=1e-5, atol=1e-5), (loss, ref)

    # Exercise the multi-tile + padded-last-tile path (B not multiple of tile).
    x_big = jax.random.normal(jax.random.PRNGKey(0), (20, 128, 1),
                              dtype=jnp.float32)
    loss2 = jax.block_until_ready(nce_softmax_loss(x_big, tile_b=8))
    xb2d = x_big[..., 0]
    ref2 = jnp.mean(jax.nn.logsumexp(xb2d, axis=-1) - xb2d[:, 0])
    assert jnp.allclose(loss2, ref2, rtol=1e-5, atol=1e-5), (loss2, ref2)

    # bf16 input: no wrapper cast; the kernel upcasts in-register.
    x_bf16 = x.astype(jnp.bfloat16)
    loss3 = jax.block_until_ready(nce_softmax_loss(x_bf16))
    xbf = x_bf16[..., 0].astype(jnp.float32)
    ref3 = jnp.mean(jax.nn.logsumexp(xbf, axis=-1) - xbf[:, 0])
    assert jnp.allclose(loss3, ref3, rtol=2e-2, atol=2e-2), (loss3, ref3)

    print("KERNEL_OK")
</pallas_src>

<mosaic_0001>
module attributes {stable_mosaic.version = 11 : i64} {
  func.func @kernel(%arg0: i32, %arg1: memref<8x128xf32, #tpu.memory_space<vmem>>, %arg2: memref<1x1xf32, #tpu.memory_space<vmem>>, %arg3: memref<1x1xf32, #tpu.memory_space<vmem>>) attributes {dimension_semantics = [#tpu.dimension_semantics<arbitrary>], iteration_bounds = array<i64: 1>, scalar_prefetch = 0 : i64, scratch_operands = 1 : i64, tpu.core_type = #tpu.core_type<tc>, window_params = [{transform_indices = @transform_0, window_bounds = array<i64: 8, 128>}, {pipeline_mode = #tpu.pipeline_mode<synchronous>, transform_indices = @transform_1, window_bounds = array<i64: 1, 1>}]} {
    %c0_i32 = arith.constant 0 : i32
    %0 = arith.cmpi eq, %arg0, %c0_i32 : i32
    %1 = arith.extui %0 : i1 to i32
    %c0_i32_0 = arith.constant 0 : i32
    %2 = arith.cmpi ne, %1, %c0_i32_0 : i32
    scf.if %2 {
      %cst_10 = arith.constant 0.000000e+00 : f32
      %26 = vector.broadcast %cst_10 : f32 to vector<1x1xf32>
      %c0_11 = arith.constant 0 : index
      %c0_12 = arith.constant 0 : index
      %27 = vector.load %arg3[%c0_11, %c0_12] : memref<1x1xf32, #tpu.memory_space<vmem>>, vector<1x1xf32>
      tpu.vector_store %arg3[%c0_11, %c0_12], %26 {strides = array<i32>} : memref<1x1xf32, #tpu.memory_space<vmem>>, vector<1x1xf32>,
    } else {
    }
    %c0 = arith.constant 0 : index
    %c0_1 = arith.constant 0 : index
    %3 = vector.load %arg1[%c0, %c0_1] : memref<8x128xf32, #tpu.memory_space<vmem>>, vector<8x128xf32>
    %cst = arith.constant dense<0xFF800000> : vector<8xf32>
    %4 = vector.multi_reduction <maximumf>, %3, %cst [1] : vector<8x128xf32> to vector<8xf32>
    %5 = vector.shape_cast %4 : vector<8xf32> to vector<8x1xf32>
    %6 = vector.broadcast %5 : vector<8x1xf32> to vector<8x128xf32>
    %7 = arith.subf %3, %6 : vector<8x128xf32>
    %8 = math.exp %7 : vector<8x128xf32>
    %cst_2 = arith.constant dense<0.000000e+00> : vector<8xf32>
    %9 = vector.multi_reduction <add>, %8, %cst_2 [1] : vector<8x128xf32> to vector<8xf32>
    %10 = vector.shape_cast %9 : vector<8xf32> to vector<8x1xf32>
    %11 = math.log %10 : vector<8x1xf32>
    %12 = arith.addf %5, %11 : vector<8x1xf32>
    %13 = vector.extract_strided_slice %3 {offsets = [0, 0], sizes = [8, 1], strides = [1, 1]} : vector<8x128xf32> to vector<8x1xf32>
    %14 = arith.subf %12, %13 : vector<8x1xf32>
    %c0_3 = arith.constant 0 : index
    %c0_4 = arith.constant 0 : index
    %15 = vector.load %arg3[%c0_3, %c0_4] : memref<1x1xf32, #tpu.memory_space<vmem>>, vector<1x1xf32>
    %16 = vector.shape_cast %14 : vector<8x1xf32> to vector<1x8x1xf32>
    %cst_5 = arith.constant dense<0.000000e+00> : vector<1xf32>
    %17 = vector.multi_reduction <add>, %16, %cst_5 [1, 2] : vector<1x8x1xf32> to vector<1xf32>
    %18 = vector.shape_cast %17 : vector<1xf32> to vector<1x1x1xf32>
    %19 = vector.extract %18[0, 0, 0] : f32 from vector<1x1x1xf32>
    %20 = vector.broadcast %19 : f32 to vector<1x1xf32>
    %21 = arith.addf %15, %20 : vector<1x1xf32>
    %c0_6 = arith.constant 0 : index
    %c0_7 = arith.constant 0 : index
    %22 = vector.load %arg3[%c0_6, %c0_7] : memref<1x1xf32, #tpu.memory_space<vmem>>, vector<1x1xf32>
    tpu.vector_store %arg3[%c0_6, %c0_7], %21 {strides = array<i32>} : memref<1x1xf32, #tpu.memory_space<vmem>>, vector<1x1xf32>,
    %c0_i32_8 = arith.constant 0 : i32
    %23 = arith.cmpi eq, %arg0, %c0_i32_8 : i32
    %24 = arith.extui %23 : i1 to i32
    %c0_i32_9 = arith.constant 0 : i32
    %25 = arith.cmpi ne, %24, %c0_i32_9 : i32
    scf.if %25 {
      %c0_10 = arith.constant 0 : index
      %c0_11 = arith.constant 0 : index
      %26 = vector.load %arg3[%c0_10, %c0_11] : memref<1x1xf32, #tpu.memory_space<vmem>>, vector<1x1xf32>
      %cst_12 = arith.constant 1.250000e-01 : f32
      %27 = vector.broadcast %cst_12 : f32 to vector<1x1xf32>
      %28 = arith.mulf %26, %27 : vector<1x1xf32>
      %c0_13 = arith.constant 0 : index
      %c0_14 = arith.constant 0 : index
      %29 = vector.load %arg2[%c0_13, %c0_14] : memref<1x1xf32, #tpu.memory_space<vmem>>, vector<1x1xf32>
      tpu.vector_store %arg2[%c0_13, %c0_14], %28 {strides = array<i32>} : memref<1x1xf32, #tpu.memory_space<vmem>>, vector<1x1xf32>,
    } else {
    }
    return
  }
  func.func @transform_0(%arg0: i32) -> (i32, i32) {
    %c0_i32 = arith.constant 0 : i32
    %c0_i32_0 = arith.constant 0 : i32
    return %arg0, %c0_i32 : i32, i32
  }
  func.func @transform_1(%arg0: i32) -> (i32, i32) {
    %c0_i32 = arith.constant 0 : i32
    %c0_i32_0 = arith.constant 0 : i32
    %c0_i32_1 = arith.constant 0 : i32
    return %c0_i32, %c0_i32_0 : i32, i32
  }
}

</mosaic_0001>

<bundles_post_ra>
// kernel: tpu_custom_call.1
= control target key start
LH: loop header
LB: loop body
LE: loop exit
PB: predicated region body
PF: predicated region fallthrough
CT: control target
= control target key end

     0   :  { %6 = vsyncpa [#allocation4], 0  ;;  %s173_s0 = inlined_call_operand.hbm [shape: f32[8,128], index: 0, kind: input, shape index: {}]   ;;  %s174_s1 = inlined_call_operand.hbm [shape: f32[1,1], index: 1, kind: output, shape index: {}]  }
   0x1   :  { %7 = vsyncpa [#allocation5], 0  ;;  %s133_s6 = smov [#allocation3]   ;;  %s85_s10 = scalar_lea.hbm %s173_s0, 128 }
   0x2   :  { %s14_s7 = sshll.u32 %s133_s6, 4  ;;  %p86_p0 = scmp.ne.s32.totalorder %s173_s0, %s85_s10  ;;  %s15_s7 = int_to_ptr.vmem [resolvable:$true] %s14_s7 }
   0x3   :  { %p89_p1 = scmp.lt.u32.totalorder %s85_s10, %s173_s0 }
   0x5   :  { %p91_p2 = pnand %p89_p1, %p86_p0 }
   0x7   :  { %94 = shalt.err (!%p91_p2)
}
   0x8   :  { %s95_s15 = scalar_lea.vmem %s15_s7, 128  ;;  %p100_p4 = scmp.lt.s32.totalorder %s15_s7, %s15_s7 }
   0x9   :  { %p96_p3 = scmp.ne.s32.totalorder %s15_s7, %s95_s15  ;;  %p101_p5 = scmp.lt.s32.totalorder %s95_s15, %s95_s15 }
   0xb   :  { %p102_p6 = por %p101_p5, %p100_p4 }
   0xd   :  { %p103_p7 = pnand %p102_p6, %p96_p3 }
   0xf   :  { %106 = shalt.err (!%p103_p7)
}
  0x10   :  { %17 = dma.hbm_to_vmem [thread:$0]  %s173_s0, 128, %s15_s7, [#allocation4]  }
  0x11   :  { %129 = dma.done.wait [#allocation4], 128  }
  0x12   :  { %130 = vsyncadd [#allocation4], 4294967168  ;;  %v27_v0 = vld [vmem:[#allocation3] sm:$0xff]  ;;  %vm40_vm0 = vcmask 7168   ;;  %vm25_vm1 = vcmask 0   ;;  %v134_v11 = vmov 0.0  }
  0x13   :  { %28 = vmax.xlane.f32.xlu0 %v27_v0  ;;  %26 = vst.msk [vmem:[#allocation2] sm:$0x1] %vm25_vm1, %v134_v11  ;;  %s135_s18 = smov [#allocation6]  }
  0x14   :  { %s67_s19 = sshll.u32 %s135_s18, 4  ;;  %s68_s19 = int_to_ptr.vmem [resolvable:$true] %s67_s19 }
  0x15   :  { %s107_s20 = scalar_lea.vmem %s68_s19, 16  ;;  %s111_s21 = scalar_lea.vmem %s68_s19, 32 }
  0x16   :  { %p108_p8 = scmp.ne.s32.totalorder %s68_s19, %s107_s20  ;;  %p112_p9 = scmp.lt.s32.totalorder %s68_s19, %s68_s19 }
  0x17   :  { %p113_p10 = scmp.lt.s32.totalorder %s111_s21, %s107_s20 }
  0x19   :  { %p114_p11 = por %p113_p10, %p112_p9 }
  0x1a   :  { %v39_v19 = vld [vmem:[#allocation2] sm:$0x1] }
  0x1b   :  { %p115_p12 = pnand %p114_p11, %p108_p8 }
  0xa0   :  { %v29_v1 = vpop.xlane.xlu0 %28 }
  0xa1   :  { %v30_v2 = vsub.f32 %v27_v0, %v29_v1 }
  0xa3   :  { %v31_v3 = vmul.f32 1.442695, %v30_v2 }
  0xa5   :  { %81 = vpow2.f32 %v31_v3 }
  0xaf   :  { %v82_v4 = vpop.eup %81 }
  0xb0   :  { %33 = vadd.xlane.f32.xlu0 %v82_v4 }
 0x13d   :  { %v34_v5 = vpop.xlane.xlu0 %33 }
 0x13e   :  { %83 = vlog2.f32 %v34_v5 }
 0x148   :  { %v84_v6 = vpop.eup %83 }
 0x149   :  { %v36_v7 = vmul.f32 0.6931472, %v84_v6 }
 0x14b   :  { %v37_v8 = vadd.f32 %v36_v7, %v29_v1 }
 0x14d   :  { %v38_v9 = vsub.f32 %v37_v8, %v27_v0 }
 0x14f   :  { %v41_v10 = vsel %vm40_vm0, %v38_v9, 0.0 }
 0x150   :  { %42 = vadd.xlane.f32.xlu1 %v41_v10 }
 0x1dd   :  { %v43_v12 = vpop.xlane.xlu1 %42 }
 0x1de   :  { %v44_v13 = vrot.slane %v43_v12, 4 }
 0x1e0   :  { %v45_v14 = vadd.f32 %v44_v13, %v43_v12 }
 0x1e2   :  { %v46_v15 = vrot.slane %v45_v14, 2 }
 0x1e4   :  { %v47_v16 = vadd.f32 %v46_v15, %v45_v14 }
 0x1e6   :  { %v48_v17 = vrot.slane %v47_v16, 1 }
 0x1e8   :  { %v49_v18 = vadd.f32 %v48_v17, %v47_v16 }
 0x1ea   :  { %76 = vpush %v49_v18 }
 0x21b   :  { %s77_s0 = spop %76 }
 0x21c   :  { %v51_v20 = vstv %s77_s0 }
 0x21d   :  { %v52_v21 = vadd.f32 %v51_v20, %v39_v19 }
 0x21f   :  { %54 = vst.msk [vmem:[#allocation2] sm:$0x1] %vm25_vm1, %v52_v21 }
 0x226   :  { %v58_v22 = vld [vmem:[#allocation2] sm:$0x1] }
 0x227   :  { %v59_v23 = vmul.f32 0.125, %v58_v22 }
 0x229   :  { %60 = vst.msk [vmem:[#allocation6] sm:$0x1] %vm25_vm1, %v59_v23 }
 0x22a   :  { %118 = shalt.err (!%p115_p12)
}
 0x22b   :  { %s119_s24 = scalar_lea.hbm %s174_s1, 16 }
 0x22c   :  { %p120_p13 = scmp.ne.s32.totalorder %s174_s1, %s119_s24  ;;  %p123_p0 = scmp.lt.u32.totalorder %s119_s24, %s174_s1 }
 0x22e   :  { %p125_p1 = pnand %p123_p0, %p120_p13 }
 0x230   :  { %128 = shalt.err (!%p125_p1)
}
 0x231   :  { %70 = dma.vmem_to_hbm [thread:$0]  %s68_s19, 16, %s174_s1, [#allocation5]  }
 0x232   :  { %131 = dma.done.wait [#allocation5], 16  }
 0x233   :  { %132 = vsyncadd [#allocation5], 4294967280 }
 0x234   :  { %74 = vsyncpa [#allocation4], 1 }
 0x235   :  { %75 = vsyncpa [#allocation5], 1 }

</bundles_post_ra>
